<compile_context>
chip_gen: v6e
topology: v6e:2x2x1
jax: 0.10.0
libtpu: 0.0.40
codegen_flags: <defaults>
</compile_context>

<pallas_src>
import functools

import jax
import jax.numpy as jnp
from jax.experimental import pallas as pl
from jax.experimental.pallas import tpu as pltpu


# Large negative fill for padded action lanes. Finite in both bf16 and f32 so
# downstream argmax / subtraction stays NaN-free, but always loses an argmax.
_NEG_FILL = -3.0e38


# ---------------------------------------------------------------------------
# Kernel: one batch tile of  relu(relu(x@W1+b1)@W2+b2)@W3+b3  -> Q slab
# ---------------------------------------------------------------------------
def dqn_kernel(x_ref, w1_ref, b1_ref, w2_ref, b2_ref, w3_ref, b3_ref, out_ref,
               *, n_actions):
    # x streams in as raw f32 (tb, input_dim); cast to bf16 on the VPU (slack).
    x = x_ref[...].astype(jnp.bfloat16)
    # fc1 + relu  (bf16 MXU inputs, f32 accumulation, f32 elementwise)
    h1 = jnp.dot(x, w1_ref[...], preferred_element_type=jnp.float32)
    h1 = jnp.maximum(h1 + b1_ref[...], 0.0)
    # fc2 + relu
    h2 = jnp.dot(h1.astype(jnp.bfloat16), w2_ref[...],
                 preferred_element_type=jnp.float32)
    h2 = jnp.maximum(h2 + b2_ref[...], 0.0)
    # fc3 (no activation -- raw Q-values)
    q = jnp.dot(h2.astype(jnp.bfloat16), w3_ref[...],
                preferred_element_type=jnp.float32)
    q = q + b3_ref[...]
    # Mask padded action lanes so the padded slab is argmax-safe downstream.
    if n_actions < q.shape[-1]:
        lane = jax.lax.broadcasted_iota(jnp.int32, q.shape, dimension=1)
        q = jnp.where(lane < n_actions, q, _NEG_FILL)
    out_ref[...] = q.astype(out_ref.dtype)


# ---------------------------------------------------------------------------
# Helpers
# ---------------------------------------------------------------------------
def _round_up(x, m):
    return (x + m - 1) // m * m


def _pad2(a, rows, cols):
    pr, pc = rows - a.shape[0], cols - a.shape[1]
    if pr == 0 and pc == 0:
        return a
    return jnp.pad(a, ((0, pr), (0, pc)))


def prepare_params(w1, b1, w2, b2, w3, b3):
    """Pad hidden/action dims to lane multiples (128) and cast weights to bf16.

    Call ONCE at init / optimizer step / target-network sync -- not per
    forward. Zero padding is mathematically exact for this MLP (padded hidden
    cols have zero weight & bias -> relu(0)=0 -> contribute nothing).
    The fc1 contraction dim (input_dim) is left unpadded: activations stream
    raw f32 and the MXU handles the small K internally.
    """
    input_dim, fc1_dims = w1.shape
    fc2_dims = w2.shape[1]
    n_actions = w3.shape[1]
    h1d = _round_up(fc1_dims, 128)
    h2d = _round_up(fc2_dims, 128)
    ad = _round_up(n_actions, 128)

    return {
        "w1": _pad2(w1, input_dim, h1d).astype(jnp.bfloat16),
        "b1": _pad2(b1.reshape(1, -1), 1, h1d).astype(jnp.float32),
        "w2": _pad2(w2, h1d, h2d).astype(jnp.bfloat16),
        "b2": _pad2(b2.reshape(1, -1), 1, h2d).astype(jnp.float32),
        "w3": _pad2(w3, h2d, ad).astype(jnp.bfloat16),
        "b3": _pad2(b3.reshape(1, -1), 1, ad).astype(jnp.float32),
        # true (unpadded) dims, kept for cost estimate / masking
        "dims": (int(input_dim), int(fc1_dims), int(fc2_dims), int(n_actions)),
    }


# ---------------------------------------------------------------------------
# Forward (hot path)
# ---------------------------------------------------------------------------
def deep_q_network_forward(state, params, *, batch_tile=None,
                           out_dtype=jnp.bfloat16):
    """Fused 3-layer MLP forward on pre-padded params.

    Returns a lane-dense (batch_padded, ad) Q slab in `out_dtype`; padded
    action lanes hold a large negative value (argmax-safe). Slice
    [:batch, :n_actions] outside the hot path only if exact PyTorch-shaped
    output is needed.
    """
    w1p, b1p = params["w1"], params["b1"]
    w2p, b2p = params["w2"], params["b2"]
    w3p, b3p = params["w3"], params["b3"]
    input_dim, fc1_dims, fc2_dims, n_actions = params["dims"]

    batch, state_dim = state.shape
    assert state_dim == input_dim, (state_dim, input_dim)
    h1d, h2d, ad = w1p.shape[1], w2p.shape[1], w3p.shape[1]

    # --- batch tile: large (overhead-bound kernel), >=2 tiles when possible --
    tile = batch_tile if batch_tile is not None else 512
    tb = min(tile, _round_up(batch, 8))
    if batch >= 16 and _round_up(batch, tb) // tb < 2:
        # Guarantee at least two grid steps so both v7x TensorCores get work.
        tb = _round_up((batch + 1) // 2, 8)
    bp = _round_up(batch, tb)

    xs = state.astype(jnp.float32)
    if bp != batch:
        xs = jnp.pad(xs, ((0, bp - batch), (0, 0)))

    grid = (bp // tb,)
    const = lambda i: (0, 0)          # weights/biases: resident in VMEM
    stream = lambda i: (i, 0)         # activations: stream batch tiles

    out_itemsize = jnp.dtype(out_dtype).itemsize

    # --- cost estimate from true (unpadded) problem dims ---------------------
    flops = 2 * batch * (input_dim * fc1_dims
                         + fc1_dims * fc2_dims
                         + fc2_dims * n_actions)
    bytes_accessed = (
        batch * input_dim * 4                                     # x (f32)
        + (input_dim * fc1_dims + fc1_dims * fc2_dims
           + fc2_dims * n_actions) * 2                            # weights bf16
        + (fc1_dims + fc2_dims + n_actions) * 4                   # biases f32
        + batch * n_actions * out_itemsize                        # Q out
    )

    # --- explicit VMEM budget (v7x: 64 MiB physical / 32 MiB default scoped) -
    resident = ((w1p.size + w2p.size + w3p.size) * 2
                + (b1p.size + b2p.size + b3p.size) * 4)
    streamed = tb * input_dim * 4 + tb * ad * out_itemsize
    interm = tb * (h1d + h2d) * 4
    vmem_bytes = 2 * resident + 2 * streamed + 2 * interm + (2 << 20)
    vmem_limit = int(min(64 << 20, max(8 << 20, vmem_bytes)))
    # NOTE: if fc1/fc2 ever grow to ~2048-4096+, the resident-w2 design exceeds
    # v7x VMEM first -- add a hidden-dim grid axis or shrink tb in that regime.

    out_slab = pl.pallas_call(
        functools.partial(dqn_kernel, n_actions=n_actions),
        out_shape=jax.ShapeDtypeStruct((bp, ad), out_dtype),
        grid=grid,
        in_specs=[
            pl.BlockSpec((tb, input_dim), stream),   # x (raw f32)
            pl.BlockSpec((input_dim, h1d), const),   # w1
            pl.BlockSpec((1, h1d), const),           # b1
            pl.BlockSpec((h1d, h2d), const),         # w2
            pl.BlockSpec((1, h2d), const),           # b2
            pl.BlockSpec((h2d, ad), const),          # w3
            pl.BlockSpec((1, ad), const),            # b3
        ],
        out_specs=pl.BlockSpec((tb, ad), stream),
        compiler_params=pltpu.CompilerParams(
            dimension_semantics=("parallel",),
            vmem_limit_bytes=vmem_limit,
        ),
        cost_estimate=pl.CostEstimate(
            flops=int(flops),
            transcendentals=0,
            bytes_accessed=int(bytes_accessed),
        ),
    )(xs, w1p, b1p, w2p, b2p, w3p, b3p)

    return out_slab


# ---------------------------------------------------------------------------
# Params (PyTorch-default-like Linear init, weights stored as (in, out))
# ---------------------------------------------------------------------------
def init_params(key, input_dim, fc1_dims, fc2_dims, n_actions):
    ks = jax.random.split(key, 6)

    def lin(kw, kb, fan_in, fan_out):
        bound = 1.0 / jnp.sqrt(fan_in)
        w = jax.random.uniform(kw, (fan_in, fan_out), jnp.float32, -bound, bound)
        b = jax.random.uniform(kb, (fan_out,), jnp.float32, -bound, bound)
        return w, b

    w1, b1 = lin(ks[0], ks[1], input_dim, fc1_dims)
    w2, b2 = lin(ks[2], ks[3], fc1_dims, fc2_dims)
    w3, b3 = lin(ks[4], ks[5], fc2_dims, n_actions)
    return w1, b1, w2, b2, w3, b3


if __name__ == "__main__":
    # Small shapes consistent with the module: input_dims=(8,), fc1=32, fc2=32,
    # n_actions=4, batch=8.
    batch, input_dim, fc1_dims, fc2_dims, n_actions = 8, 8, 32, 32, 4

    key = jax.random.PRNGKey(0)
    k_state, k_params = jax.random.split(key)
    state = jax.random.normal(k_state, (batch, input_dim), jnp.float32)
    raw = init_params(k_params, input_dim, fc1_dims, fc2_dims, n_actions)

    # One-time param prep (off the hot path: init / target-net sync only).
    params = prepare_params(*raw)

    q_slab = deep_q_network_forward(state, params)
    q_slab = jax.block_until_ready(q_slab)

    # Pure-JAX f32 reference of the same forward-pass semantics.
    w1, b1, w2, b2, w3, b3 = raw
    h1 = jnp.maximum(state @ w1 + b1, 0.0)
    h2 = jnp.maximum(h1 @ w2 + b2, 0.0)
    ref = h2 @ w3 + b3

    # Verification slice (outside the hot path); production callers argmax the
    # padded slab directly.
    actions = q_slab[:batch, :n_actions].astype(jnp.float32)
    assert actions.shape == (batch, n_actions)
    # bf16 MXU inputs + bf16 output with f32 accumulation -> loosened tolerance.
    assert jnp.allclose(actions, ref, atol=5e-2, rtol=5e-2), (
        jnp.max(jnp.abs(actions - ref)))
    # Padded action lanes are masked to a huge negative -> argmax-safe slab.
    assert bool(jnp.all(q_slab[:batch, n_actions:].astype(jnp.float32) < -1e37))

    print("KERNEL_OK")
</pallas_src>

<mosaic_0001>
module attributes {stable_mosaic.version = 11 : i64} {
  func.func @dqn_kernel(%arg0: i32, %arg1: memref<8x8xf32, #tpu.memory_space<vmem>>, %arg2: memref<8x128xbf16, #tpu.memory_space<vmem>>, %arg3: memref<1x128xf32, #tpu.memory_space<vmem>>, %arg4: memref<128x128xbf16, #tpu.memory_space<vmem>>, %arg5: memref<1x128xf32, #tpu.memory_space<vmem>>, %arg6: memref<128x128xbf16, #tpu.memory_space<vmem>>, %arg7: memref<1x128xf32, #tpu.memory_space<vmem>>, %arg8: memref<8x128xbf16, #tpu.memory_space<vmem>>) attributes {dimension_semantics = [#tpu.dimension_semantics<parallel>], iteration_bounds = array<i64: 1>, scalar_prefetch = 0 : i64, scratch_operands = 0 : i64, tpu.core_type = #tpu.core_type<tc>, window_params = [{transform_indices = @transform_0, window_bounds = array<i64: 8, 8>}, {pipeline_mode = #tpu.pipeline_mode<synchronous>, transform_indices = @transform_1, window_bounds = array<i64: 8, 128>}, {pipeline_mode = #tpu.pipeline_mode<synchronous>, transform_indices = @transform_2, window_bounds = array<i64: 1, 128>}, {pipeline_mode = #tpu.pipeline_mode<synchronous>, transform_indices = @transform_3, window_bounds = array<i64: 128, 128>}, {pipeline_mode = #tpu.pipeline_mode<synchronous>, transform_indices = @transform_4, window_bounds = array<i64: 1, 128>}, {pipeline_mode = #tpu.pipeline_mode<synchronous>, transform_indices = @transform_5, window_bounds = array<i64: 128, 128>}, {pipeline_mode = #tpu.pipeline_mode<synchronous>, transform_indices = @transform_6, window_bounds = array<i64: 1, 128>}, {transform_indices = @transform_7, window_bounds = array<i64: 8, 128>}]} {
    %c0 = arith.constant 0 : index
    %c0_0 = arith.constant 0 : index
    %0 = vector.load %arg1[%c0, %c0_0] : memref<8x8xf32, #tpu.memory_space<vmem>>, vector<8x8xf32>
    %1 = arith.truncf %0 : vector<8x8xf32> to vector<8x8xbf16>
    %c0_1 = arith.constant 0 : index
    %c0_2 = arith.constant 0 : index
    %2 = vector.load %arg2[%c0_1, %c0_2] : memref<8x128xbf16, #tpu.memory_space<vmem>>, vector<8x128xbf16>
    %cst = arith.constant dense<0.000000e+00> : vector<8x128xf32>
    %3 = tpu.matmul %1, %2, %cst {dimension_numbers = #tpu.dot_dimension_numbers<[1], [0], [0], [1], [0, 0, 1, 1], [], []>} : vector<8x8xbf16>, vector<8x128xbf16>, vector<8x128xf32> -> vector<8x128xf32>
    %c0_3 = arith.constant 0 : index
    %c0_4 = arith.constant 0 : index
    %4 = vector.load %arg3[%c0_3, %c0_4] : memref<1x128xf32, #tpu.memory_space<vmem>>, vector<1x128xf32>
    %5 = vector.broadcast %4 : vector<1x128xf32> to vector<8x128xf32>
    %6 = arith.addf %3, %5 : vector<8x128xf32>
    %cst_5 = arith.constant 0.000000e+00 : f32
    %7 = vector.broadcast %cst_5 : f32 to vector<8x128xf32>
    %8 = arith.maximumf %6, %7 : vector<8x128xf32>
    %9 = arith.truncf %8 : vector<8x128xf32> to vector<8x128xbf16>
    %c0_6 = arith.constant 0 : index
    %c0_7 = arith.constant 0 : index
    %10 = vector.load %arg4[%c0_6, %c0_7] : memref<128x128xbf16, #tpu.memory_space<vmem>>, vector<128x128xbf16>
    %cst_8 = arith.constant dense<0.000000e+00> : vector<8x128xf32>
    %11 = tpu.matmul %9, %10, %cst_8 {dimension_numbers = #tpu.dot_dimension_numbers<[1], [0], [0], [1], [0, 0, 1, 1], [], []>} : vector<8x128xbf16>, vector<128x128xbf16>, vector<8x128xf32> -> vector<8x128xf32>
    %c0_9 = arith.constant 0 : index
    %c0_10 = arith.constant 0 : index
    %12 = vector.load %arg5[%c0_9, %c0_10] : memref<1x128xf32, #tpu.memory_space<vmem>>, vector<1x128xf32>
    %13 = vector.broadcast %12 : vector<1x128xf32> to vector<8x128xf32>
    %14 = arith.addf %11, %13 : vector<8x128xf32>
    %cst_11 = arith.constant 0.000000e+00 : f32
    %15 = vector.broadcast %cst_11 : f32 to vector<8x128xf32>
    %16 = arith.maximumf %14, %15 : vector<8x128xf32>
    %17 = arith.truncf %16 : vector<8x128xf32> to vector<8x128xbf16>
    %c0_12 = arith.constant 0 : index
    %c0_13 = arith.constant 0 : index
    %18 = vector.load %arg6[%c0_12, %c0_13] : memref<128x128xbf16, #tpu.memory_space<vmem>>, vector<128x128xbf16>
    %cst_14 = arith.constant dense<0.000000e+00> : vector<8x128xf32>
    %19 = tpu.matmul %17, %18, %cst_14 {dimension_numbers = #tpu.dot_dimension_numbers<[1], [0], [0], [1], [0, 0, 1, 1], [], []>} : vector<8x128xbf16>, vector<128x128xbf16>, vector<8x128xf32> -> vector<8x128xf32>
    %c0_15 = arith.constant 0 : index
    %c0_16 = arith.constant 0 : index
    %20 = vector.load %arg7[%c0_15, %c0_16] : memref<1x128xf32, #tpu.memory_space<vmem>>, vector<1x128xf32>
    %21 = vector.broadcast %20 : vector<1x128xf32> to vector<8x128xf32>
    %22 = arith.addf %19, %21 : vector<8x128xf32>
    %23 = tpu.iota {dimensions = array<i32: 1>} : vector<8x128xi32>
    %c4_i32 = arith.constant 4 : i32
    %24 = vector.broadcast %c4_i32 : i32 to vector<8x128xi32>
    %25 = arith.cmpi slt, %23, %24 : vector<8x128xi32>
    %cst_17 = arith.constant -3.000000e+38 : f32
    %26 = vector.broadcast %cst_17 : f32 to vector<8x128xf32>
    %27 = arith.select %25, %22, %26 : vector<8x128xi1>, vector<8x128xf32>
    %28 = arith.truncf %27 : vector<8x128xf32> to vector<8x128xbf16>
    %c0_18 = arith.constant 0 : index
    %c0_19 = arith.constant 0 : index
    %29 = vector.load %arg8[%c0_18, %c0_19] : memref<8x128xbf16, #tpu.memory_space<vmem>>, vector<8x128xbf16>
    tpu.vector_store %arg8[%c0_18, %c0_19], %28 {strides = array<i32>} : memref<8x128xbf16, #tpu.memory_space<vmem>>, vector<8x128xbf16>,
    return
  }
  func.func @transform_0(%arg0: i32) -> (i32, i32) {
    %c0_i32 = arith.constant 0 : i32
    %c0_i32_0 = arith.constant 0 : i32
    return %arg0, %c0_i32 : i32, i32
  }
  func.func @transform_1(%arg0: i32) -> (i32, i32) {
    %c0_i32 = arith.constant 0 : i32
    %c0_i32_0 = arith.constant 0 : i32
    %c0_i32_1 = arith.constant 0 : i32
    return %c0_i32, %c0_i32_0 : i32, i32
  }
  func.func @transform_2(%arg0: i32) -> (i32, i32) {
    %c0_i32 = arith.constant 0 : i32
    %c0_i32_0 = arith.constant 0 : i32
    %c0_i32_1 = arith.constant 0 : i32
    return %c0_i32, %c0_i32_0 : i32, i32
  }
  func.func @transform_3(%arg0: i32) -> (i32, i32) {
    %c0_i32 = arith.constant 0 : i32
    %c0_i32_0 = arith.constant 0 : i32
    %c0_i32_1 = arith.constant 0 : i32
    return %c0_i32, %c0_i32_0 : i32, i32
  }
  func.func @transform_4(%arg0: i32) -> (i32, i32) {
    %c0_i32 = arith.constant 0 : i32
    %c0_i32_0 = arith.constant 0 : i32
    %c0_i32_1 = arith.constant 0 : i32
    return %c0_i32, %c0_i32_0 : i32, i32
  }
  func.func @transform_5(%arg0: i32) -> (i32, i32) {
    %c0_i32 = arith.constant 0 : i32
    %c0_i32_0 = arith.constant 0 : i32
    %c0_i32_1 = arith.constant 0 : i32
    return %c0_i32, %c0_i32_0 : i32, i32
  }
  func.func @transform_6(%arg0: i32) -> (i32, i32) {
    %c0_i32 = arith.constant 0 : i32
    %c0_i32_0 = arith.constant 0 : i32
    %c0_i32_1 = arith.constant 0 : i32
    return %c0_i32, %c0_i32_0 : i32, i32
  }
  func.func @transform_7(%arg0: i32) -> (i32, i32) {
    %c0_i32 = arith.constant 0 : i32
    %c0_i32_0 = arith.constant 0 : i32
    return %arg0, %c0_i32 : i32, i32
  }
}

</mosaic_0001>

<bundles_post_ra>
// kernel: tpu_custom_call.1
= control target key start
LH: loop header
LB: loop body
LE: loop exit
PB: predicated region body
PF: predicated region fallthrough
CT: control target
= control target key end

     0   :  { %12 = vsyncpa [#allocation3], 0  ;;  %s701_s0 = inlined_call_operand.hbm [shape: f32[8,8], index: 0, kind: input, shape index: {}]   ;;  %s702_s1 = inlined_call_operand.hbm [shape: bf16[8,128], index: 1, kind: input, shape index: {}]   ;;  %s703_s2 = inlined_call_operand.vmem [shape: f32[1,128], index: 2, kind: input, shape index: {}]   ;;  %s704_s3 = inlined_call_operand.hbm [shape: bf16[128,128], index: 3, kind: input, shape index: {}]   ;;  %s705_s4 = inlined_call_operand.vmem [shape: f32[1,128], index: 4, kind: input, shape index: {}]   ;;  %s706_s5 = inlined_call_operand.hbm [shape: bf16[128,128], index: 5, kind: input, shape index: {}]   ;;  %s707_s6 = inlined_call_operand.vmem [shape: f32[1,128], index: 6, kind: input, shape index: {}]   ;;  %s708_s7 = inlined_call_operand.hbm [shape: bf16[8,128], index: 7, kind: output, shape index: {}]  }
   0x1   :  { %13 = vsyncpa [#allocation6], 0 }
   0x2   :  { %14 = vsyncpa [#allocation9], 0 }
   0x3   :  { %15 = vsyncpa [#allocation4], 0  ;;  %s605_s24 = smov [#allocation5]   ;;  %s606_s26 = smov [#allocation2]  }
   0x4   :  { %s32_s25 = sshll.u32 %s605_s24, 4  ;;  %s22_s27 = sshll.u32 %s606_s26, 4  ;;  %s33_s25 = int_to_ptr.vmem [resolvable:$true] %s32_s25  ;;  %s23_s27 = int_to_ptr.vmem [resolvable:$true] %s22_s27 }
   0x5   :  { %s505_s28 = scalar_lea.vmem %s33_s25, 64  ;;  %p510_p1 = scmp.lt.s32.totalorder %s33_s25, %s33_s25 }
   0x6   :  { %p506_p0 = scmp.ne.s32.totalorder %s33_s25, %s505_s28  ;;  %p511_p2 = scmp.lt.s32.totalorder %s505_s28, %s505_s28 }
   0x8   :  { %p512_p3 = por %p511_p2, %p510_p1 }
   0xa   :  { %p513_p4 = pnand %p512_p3, %p506_p0 }
   0xc   :  { %516 = shalt.err (!%p513_p4)
}
   0xd   :  { %35 = dma.hbm_to_vmem [thread:$0]  %s702_s1, 64, %s33_s25, [#allocation6]  }
   0xe   :  { %s525_s8 = scalar_lea.vmem %s23_s27, 128  ;;  %p530_p6 = scmp.lt.s32.totalorder %s23_s27, %s23_s27 }
   0xf   :  { %p526_p5 = scmp.ne.s32.totalorder %s23_s27, %s525_s8  ;;  %p531_p7 = scmp.lt.s32.totalorder %s525_s8, %s525_s8 }
  0x11   :  { %p532_p8 = por %p531_p7, %p530_p6 }
  0x13   :  { %p533_p9 = pnand %p532_p8, %p526_p5 }
  0x15   :  { %536 = shalt.err (!%p533_p9)
}
  0x16   :  { %25 = dma.hbm_to_vmem [thread:$0]  %s701_s0, 128, %s23_s27, [#allocation3]  }
  0x17   :  { %s607_s11 = smov [#allocation7]  }
  0x18   :  { %s43_s12 = sshll.u32 %s607_s11, 4  ;;  %s44_s12 = int_to_ptr.vmem [resolvable:$true] %s43_s12 }
  0x19   :  { %s545_s13 = scalar_lea.vmem %s44_s12, 1024  ;;  %p550_p11 = scmp.lt.s32.totalorder %s44_s12, %s44_s12 }
  0x1a   :  { %p546_p10 = scmp.ne.s32.totalorder %s44_s12, %s545_s13  ;;  %p551_p12 = scmp.lt.s32.totalorder %s545_s13, %s545_s13 }
  0x1c   :  { %p552_p13 = por %p551_p12, %p550_p11 }
  0x1e   :  { %p553_p0 = pnand %p552_p13, %p546_p10 }
  0x20   :  { %556 = shalt.err (!%p553_p0)
}
  0x21   :  { %s608_s1 = smov 64   ;;  %s609_s14 = smov 4  }
  0x22   :  { %49 = dma.hbm_to_vmem [thread:$0]  %s704_s3, 1024, %s44_s12, [#allocation6], %s608_s1, %s608_s1, %s609_s14  }
  0x23   :  { %s610_s17 = smov [#allocation8]  }
  0x24   :  { %s57_s18 = sshll.u32 %s610_s17, 4  ;;  %s58_s18 = int_to_ptr.vmem [resolvable:$true] %s57_s18 }
  0x25   :  { %s565_s0 = scalar_lea.vmem %s58_s18, 1024  ;;  %p570_p2 = scmp.lt.s32.totalorder %s58_s18, %s58_s18 }
  0x26   :  { %p566_p1 = scmp.ne.s32.totalorder %s58_s18, %s565_s0  ;;  %p571_p3 = scmp.lt.s32.totalorder %s565_s0, %s565_s0 }
  0x28   :  { %p572_p4 = por %p571_p3, %p570_p2 }
  0x2a   :  { %p573_p5 = pnand %p572_p4, %p566_p1 }
  0x2c   :  { %576 = shalt.err (!%p573_p5)
}
  0x2d   :  { %63 = dma.hbm_to_vmem [thread:$0]  %s706_s5, 1024, %s58_s18, [#allocation9], %s608_s1, %s608_s1, %s609_s14  }
  0x2e   :  { %597 = dma.done.wait [#allocation3], 128  }
  0x2f   :  { %598 = vsyncadd [#allocation3], 4294967168 }
  0x30   :  { %599 = dma.done.wait [#allocation6], 1088  }
  0x31   :  { %600 = vsyncadd [#allocation6], 4294966208 }
  0x32   :  { %601 = dma.done.wait [#allocation9], 1024  }
  0x33   :  { %602 = vsyncadd [#allocation9], 4294966272  ;;  %v611_v0 = vmov 0.0   ;;  %vm612_vm0 = vmmov 0   ;;  %vm93_vm1 = vcmask 1043456   ;;  %v79_v2 = vld [vmem:[#allocation2] sm:$0xff]  ;;  %v363_v37 = vlaneseq }
  0x34   :  { %426 = vmatprep.subr.bf16.mxu0 %v611_v0  ;;  %428 = vmatprep.mubr.msk.bf16.mxu0 %vm612_vm0, %v611_v0  ;;  %v81_v1 = vld [vmem:[#allocation5] sm:$0xf]  ;;  %v80_v4 = vpack.c.bf16 %v79_v2, %v79_v2  ;;  %vm89_vm2 = vcmask 64512   ;;  %v482_v6 = vld [vmem:[#allocation7 + $0x30] sm:$0xff]   ;;  %v483_v7 = vld [vmem:[#allocation7 + $0x28] sm:$0xff]   ;;  %s613_s24 = smov [#allocation10]  }
  0x35   :  { %432 = vmatprep.subr.bf16.mxu1 %v611_v0  ;;  %448 = vmatprep.mubr.msk.bf16.mxu1 %vm612_vm0, %v611_v0  ;;  %v95_v3 = vsel %vm93_vm1, %v81_v1, 0  ;;  %v481_v5 = vld [vmem:[#allocation7 + $0x38] sm:$0xff]   ;;  %v484_v8 = vld [vmem:[#allocation7 + $0x20] sm:$0xff]   ;;  %v486_v10 = vld [vmem:[#allocation7 + $0x10] sm:$0xff]   ;;  %v364_v38 = vand.u32 127, %v363_v37  ;;  %s375_s25 = sshll.u32 %s613_s24, 4  ;;  %s376_s25 = int_to_ptr.vmem [resolvable:$true] %s375_s25 }
  0x36   :  { %427 = vmatpush3.bf16.msra.mxu0 %v95_v3  ;;  %433 = vmatpush3.bf16.msra.mxu1 %v481_v5  ;;  %v485_v9 = vld [vmem:[#allocation7 + $0x18] sm:$0xff]   ;;  %v487_v11 = vld [vmem:[#allocation7 + $0x8] sm:$0xff]   ;;  %v488_v12 = vld [vmem:[#allocation7] sm:$0xff]   ;;  %p582_p7 = scmp.lt.s32.totalorder %s376_s25, %s376_s25 }
  0x37   :  { %452 = vmatprep.subr.bf16.mxu0 %v611_v0  ;;  %434 = vmatprep.subr.bf16.mxu1 %v611_v0  ;;  %v489_v13 = vld [vmem:[#allocation8 + $0x38] sm:$0xff]   ;;  %v490_v14 = vld [vmem:[#allocation8 + $0x30] sm:$0xff]   ;;  %v491_v15 = vld [vmem:[#allocation8 + $0x28] sm:$0xff]   ;;  %vm365_vm3 = vcmp.lt.s32.totalorder %v364_v38, 4 }
  0x38   :  { %v492_v16 = vld [vmem:[#allocation8 + $0x20] sm:$0xff]   ;;  %v493_v17 = vld [vmem:[#allocation8 + $0x18] sm:$0xff]   ;;  %v494_v18 = vld [vmem:[#allocation8 + $0x10] sm:$0xff]  }
  0x39   :  { %429 = vmatmul.mubr.msk.bf16.vlgmr.msra.gmra.mxu0 %vm89_vm2, %v80_v4  ;;  %v386_v19 = vld [vmem:[%s703_s2] ss:$0 sm:$0xff]  ;;  %v495_v27 = vld [vmem:[#allocation8 + $0x8] sm:$0xff]   ;;  %v496_v28 = vld [vmem:[#allocation8] sm:$0xff]  }
  0x3a   :  { %468 = vmatprep.mubr.msk.bf16.mxu0 %vm612_vm0, %v611_v0  ;;  %435 = vmatpush3.bf16.msra.mxu1 %v482_v6  ;;  %v388_v29 = vld [vmem:[%s705_s4] ss:$0 sm:$0xff]  ;;  %s577_s4 = scalar_lea.vmem %s376_s25, 64 }
  0x3b   :  { %436 = vmatprep.subr.bf16.mxu1 %v611_v0  ;;  %453 = vmatpush3.bf16.msra.mxu0 %v489_v13  ;;  %v397_v39 = vld [vmem:[%s707_s6] ss:$0 sm:$0xff]  ;;  %p578_p6 = scmp.ne.s32.totalorder %s376_s25, %s577_s4  ;;  %p583_p8 = scmp.lt.s32.totalorder %s577_s4, %s577_s4 }
  0x3c   :  { %454 = vmatprep.subr.bf16.mxu0 %v611_v0 }
  0x3d   :  { %p584_p9 = por %p583_p8, %p582_p7 }
  0x3e   :  { %437 = vmatpush3.bf16.msra.mxu1 %v483_v7 }
  0x3f   :  { %438 = vmatprep.subr.bf16.mxu1 %v611_v0  ;;  %455 = vmatpush3.bf16.msra.mxu0 %v490_v14  ;;  %p585_p10 = pnand %p584_p9, %p578_p6 }
  0x40   :  { %456 = vmatprep.subr.bf16.mxu0 %v611_v0 }
  0x42   :  { %439 = vmatpush3.bf16.msra.mxu1 %v484_v8 }
  0x43   :  { %440 = vmatprep.subr.bf16.mxu1 %v611_v0  ;;  %457 = vmatpush3.bf16.msra.mxu0 %v491_v15 }
  0x44   :  { %458 = vmatprep.subr.bf16.mxu0 %v611_v0 }
  0x46   :  { %441 = vmatpush3.bf16.msra.mxu1 %v485_v9 }
  0x47   :  { %442 = vmatprep.subr.bf16.mxu1 %v611_v0  ;;  %459 = vmatpush3.bf16.msra.mxu0 %v492_v16 }
  0x48   :  { %460 = vmatprep.subr.bf16.mxu0 %v611_v0 }
  0x4a   :  { %443 = vmatpush3.bf16.msra.mxu1 %v486_v10 }
  0x4b   :  { %444 = vmatprep.subr.bf16.mxu1 %v611_v0  ;;  %461 = vmatpush3.bf16.msra.mxu0 %v493_v17 }
  0x4c   :  { %462 = vmatprep.subr.bf16.mxu0 %v611_v0 }
  0x4e   :  { %445 = vmatpush3.bf16.msra.mxu1 %v487_v11 }
  0x4f   :  { %446 = vmatprep.subr.bf16.mxu1 %v611_v0  ;;  %463 = vmatpush3.bf16.msra.mxu0 %v494_v18 }
  0x50   :  { %464 = vmatprep.subr.bf16.mxu0 %v611_v0 }
  0x52   :  { %447 = vmatpush3.bf16.msra.mxu1 %v488_v12 }
  0x53   :  { %465 = vmatpush3.bf16.msra.mxu0 %v495_v27 }
  0x54   :  { %466 = vmatprep.subr.bf16.mxu0 %v611_v0 }
  0x57   :  { %467 = vmatpush3.bf16.msra.mxu0 %v496_v28 }
  0xf9   :  { %v131_v20 = vpop.f32.mrf.mxu0 }
  0xfa   :  { %v132_v21 = vadd.f32 %v386_v19, %v131_v20 }
  0xfb   :  { %v430_v22 = vpop.f32.mrf.mxu0 }
  0xfc   :  { %v137_v23 = vmax.f32 %v132_v21, 0.0 }
  0xfd   :  { %v134_v24 = vpop.f32.mrf.mxu0 }
  0xfe   :  { %v138_v25 = vpack.c.bf16 %v137_v23, %v137_v23 }
  0xff   :  { %v431_v26 = vpop.f32.mrf.mxu0 }
 0x100   :  { %449 = vmatmul.mubr.bf16.vlgmr.msra.gmra.mxu1 %v138_v25 }
 0x1c0   :  { %v244_v30 = vpop.f32.mrf.mxu1 }
 0x1c1   :  { %v245_v31 = vadd.f32 %v388_v29, %v244_v30 }
 0x1c2   :  { %v450_v32 = vpop.f32.mrf.mxu1 }
 0x1c3   :  { %v250_v33 = vmax.f32 %v245_v31, 0.0 }
 0x1c4   :  { %v247_v34 = vpop.f32.mrf.mxu1 }
 0x1c5   :  { %v251_v35 = vpack.c.bf16 %v250_v33, %v250_v33 }
 0x1c6   :  { %v451_v36 = vpop.f32.mrf.mxu1 }
 0x1c7   :  { %469 = vmatmul.mubr.bf16.vlgmr.msra.gmra.mxu0 %v251_v35 }
 0x287   :  { %v357_v40 = vpop.f32.mrf.mxu0 }
 0x288   :  { %v358_v41 = vadd.f32 %v397_v39, %v357_v40 }
 0x289   :  { %v470_v42 = vpop.f32.mrf.mxu0 }
 0x28a   :  { %v366_v43 = vsel %vm365_vm3, %v358_v41, -3e+38 }
 0x28b   :  { %v367_v44 = vpack.c.bf16 %v366_v43, %v366_v43  ;;  %v360_v45 = vpop.f32.mrf.mxu0 }
 0x28d   :  { %368 = vst [vmem:[#allocation10] sm:$0xf] %v367_v44  ;;  %v471_v46 = vpop.f32.mrf.mxu0 }
 0x28e   :  { %588 = shalt.err (!%p585_p10)
}
 0x28f   :  { %378 = dma.vmem_to_hbm [thread:$0]  %s376_s25, 64, %s708_s7, [#allocation4]  }
 0x290   :  { %603 = dma.done.wait [#allocation4], 64  }
 0x291   :  { %604 = vsyncadd [#allocation4], 4294967232 }
 0x292   :  { %382 = vsyncpa [#allocation3], 1 }
 0x293   :  { %383 = vsyncpa [#allocation6], 1 }
 0x294   :  { %384 = vsyncpa [#allocation9], 1 }
 0x295   :  { %385 = vsyncpa [#allocation4], 1 }

</bundles_post_ra>
